<compile_context>
chip_gen: v6e
topology: v6e:2x2x1
jax: 0.10.0
libtpu: 0.0.40
codegen_flags: <defaults>
</compile_context>

<pallas_src>
import jax
import jax.numpy as jnp
from jax import lax
from jax.experimental import pallas as pl
from jax.experimental.pallas import tpu as pltpu

INPUT_DIM = 20
BATCH = 2


def control_flow_kernel(x_ref, w_ref, b_ref, o_ref):
    x = x_ref[...]                      # (B, D_in) f32
    w = w_ref[...]                      # (D_out, D_in) f32, PyTorch layout
    b = b_ref[...]                      # (1, D_out) f32

    # Squared Frobenius norm of the whole input.  norm > 1  <=>  norm^2 > 1.
    sq_sum = jnp.sum(x * x)

    # Branch 1: nn.Linear -> X @ W.T + b. Contract x dim 1 with w dim 1 so the
    # MXU consumes W directly in (D_out, D_in) layout (no transpose anywhere).
    lin = lax.dot_general(
        x, w,
        dimension_numbers=(((1,), (1,)), ((), ())),
        preferred_element_type=jnp.float32,
    ) + b
    # Branch 2: X * 0.5  (VALU slot; free filler under the reduce latency).
    half = x * 0.5

    # Data-dependent control flow as a scalar-predicated select.
    o_ref[...] = jnp.where(sq_sum > 1.0, lin, half).astype(o_ref.dtype)


def control_flow_block(x, weight, bias):
    """x: (B, D) f32; weight: (D_out, D_in) f32 (PyTorch layout); bias: (D_out,)."""
    B, D = x.shape
    b2d = bias.reshape(1, D)             # keep >=2D for clean VMEM layout

    return pl.pallas_call(
        control_flow_kernel,
        out_shape=jax.ShapeDtypeStruct((B, D), jnp.float32),
        in_specs=[
            pl.BlockSpec(memory_space=pltpu.VMEM),
            pl.BlockSpec(memory_space=pltpu.VMEM),
            pl.BlockSpec(memory_space=pltpu.VMEM),
        ],
        out_specs=pl.BlockSpec(memory_space=pltpu.VMEM),
    )(x, weight, b2d)


def reference(x, weight, bias):
    norm = jnp.sqrt(jnp.sum(x * x))
    return jnp.where(norm > 1.0, x @ weight.T + bias, x * 0.5)


if __name__ == "__main__":
    key = jax.random.PRNGKey(0)
    kx, kw, kb = jax.random.split(key, 3)

    # Input analogous to torch.rand(2, input_dim): uniform [0, 1).
    x = jax.random.uniform(kx, (BATCH, INPUT_DIM), dtype=jnp.float32)

    # Deterministic parameter init (uniform(-1/sqrt(D), 1/sqrt(D)) like nn.Linear).
    bound = 1.0 / jnp.sqrt(jnp.float32(INPUT_DIM))
    weight = jax.random.uniform(
        kw, (INPUT_DIM, INPUT_DIM), dtype=jnp.float32, minval=-bound, maxval=bound
    )
    bias = jax.random.uniform(
        kb, (INPUT_DIM,), dtype=jnp.float32, minval=-bound, maxval=bound
    )

    out = control_flow_block(x, weight, bias)
    out = jax.block_until_ready(out)

    ref = reference(x, weight, bias)
    assert out.shape == (BATCH, INPUT_DIM)
    assert jnp.allclose(out, ref, atol=1e-5, rtol=1e-5)

    # Also exercise the "norm <= 1" branch to confirm the predicated select.
    x_small = x * 0.01
    out_small = jax.block_until_ready(control_flow_block(x_small, weight, bias))
    assert jnp.allclose(out_small, reference(x_small, weight, bias), atol=1e-5, rtol=1e-5)

    print("KERNEL_OK")
</pallas_src>

<mosaic_0001>
module attributes {stable_mosaic.version = 11 : i64} {
  func.func @control_flow_kernel(%arg0: memref<2x20xf32, #tpu.memory_space<vmem>>, %arg1: memref<20x20xf32, #tpu.memory_space<vmem>>, %arg2: memref<1x20xf32, #tpu.memory_space<vmem>>, %arg3: memref<2x20xf32, #tpu.memory_space<vmem>>) attributes {dimension_semantics = [], scalar_prefetch = 0 : i64, scratch_operands = 0 : i64, tpu.core_type = #tpu.core_type<tc>} {
    %c0 = arith.constant 0 : index
    %c0_0 = arith.constant 0 : index
    %0 = vector.load %arg0[%c0, %c0_0] : memref<2x20xf32, #tpu.memory_space<vmem>>, vector<2x20xf32>
    %c0_1 = arith.constant 0 : index
    %c0_2 = arith.constant 0 : index
    %1 = vector.load %arg1[%c0_1, %c0_2] : memref<20x20xf32, #tpu.memory_space<vmem>>, vector<20x20xf32>
    %c0_3 = arith.constant 0 : index
    %c0_4 = arith.constant 0 : index
    %2 = vector.load %arg2[%c0_3, %c0_4] : memref<1x20xf32, #tpu.memory_space<vmem>>, vector<1x20xf32>
    %3 = arith.mulf %0, %0 : vector<2x20xf32>
    %4 = vector.shape_cast %3 : vector<2x20xf32> to vector<1x2x20xf32>
    %cst = arith.constant dense<0.000000e+00> : vector<1xf32>
    %5 = vector.multi_reduction <add>, %4, %cst [1, 2] : vector<1x2x20xf32> to vector<1xf32>
    %6 = vector.shape_cast %5 : vector<1xf32> to vector<1x1x1xf32>
    %7 = vector.extract %6[0, 0, 0] : f32 from vector<1x1x1xf32>
    %cst_5 = arith.constant dense<0.000000e+00> : vector<2x20xf32>
    %8 = tpu.matmul %0, %1, %cst_5 {dimension_numbers = #tpu.dot_dimension_numbers<[1], [1], [0], [0], [0, 0, 1, 0], [], []>} : vector<2x20xf32>, vector<20x20xf32>, vector<2x20xf32> -> vector<2x20xf32>
    %9 = vector.broadcast %2 : vector<1x20xf32> to vector<2x20xf32>
    %10 = arith.addf %8, %9 : vector<2x20xf32>
    %cst_6 = arith.constant 5.000000e-01 : f32
    %11 = vector.broadcast %cst_6 : f32 to vector<2x20xf32>
    %12 = arith.mulf %0, %11 : vector<2x20xf32>
    %cst_7 = arith.constant 1.000000e+00 : f32
    %13 = arith.cmpf ogt, %7, %cst_7 : f32
    %14 = arith.select %13, %10, %12 : vector<2x20xf32>
    %c0_8 = arith.constant 0 : index
    %c0_9 = arith.constant 0 : index
    %15 = vector.load %arg3[%c0_8, %c0_9] : memref<2x20xf32, #tpu.memory_space<vmem>>, vector<2x20xf32>
    tpu.vector_store %arg3[%c0_8, %c0_9], %14 {strides = array<i32>} : memref<2x20xf32, #tpu.memory_space<vmem>>, vector<2x20xf32>,
    return
  }
}

</mosaic_0001>

<bundles_post_ra>
// kernel: tpu_custom_call.1
= control target key start
LH: loop header
LB: loop body
LE: loop exit
PB: predicated region body
PF: predicated region fallthrough
CT: control target
= control target key end

     0   :  { %8 = vsyncpa [#allocation3], 0  ;;  %s304_s0 = inlined_call_operand.hbm [shape: f32[2,20], index: 0, kind: input, shape index: {}]   ;;  %s305_s1 = inlined_call_operand.hbm [shape: f32[20,20], index: 1, kind: input, shape index: {}]   ;;  %s306_s2 = inlined_call_operand.vmem [shape: f32[1,20], index: 2, kind: input, shape index: {}]   ;;  %s307_s3 = inlined_call_operand.hbm [shape: f32[2,20], index: 3, kind: output, shape index: {}]  }
   0x1   :  { %9 = vsyncpa [#allocation6], 0 }
   0x2   :  { %10 = vsyncpa [#allocation4], 0  ;;  %s263_s12 = smov [#allocation2]   ;;  %s264_s14 = smov [#allocation5]  }
   0x3   :  { %s17_s13 = sshll.u32 %s263_s12, 4  ;;  %s26_s15 = sshll.u32 %s264_s14, 4  ;;  %s18_s13 = int_to_ptr.vmem [resolvable:$true] %s17_s13  ;;  %s27_s15 = int_to_ptr.vmem [resolvable:$true] %s26_s15 }
   0x4   :  { %s205_s16 = scalar_lea.vmem %s18_s13, 32  ;;  %p210_p1 = scmp.lt.s32.totalorder %s18_s13, %s18_s13 }
   0x5   :  { %p206_p0 = scmp.ne.s32.totalorder %s18_s13, %s205_s16  ;;  %p211_p2 = scmp.lt.s32.totalorder %s205_s16, %s205_s16 }
   0x7   :  { %p212_p3 = por %p211_p2, %p210_p1 }
   0x9   :  { %p213_p4 = pnand %p212_p3, %p206_p0 }
   0xb   :  { %216 = shalt.err (!%p213_p4)
}
   0xc   :  { %20 = dma.hbm_to_vmem [thread:$0]  %s304_s0, 32, %s18_s13, [#allocation3]  }
   0xd   :  { %s225_s19 = scalar_lea.vmem %s27_s15, 384  ;;  %p230_p6 = scmp.lt.s32.totalorder %s27_s15, %s27_s15 }
   0xe   :  { %p226_p5 = scmp.ne.s32.totalorder %s27_s15, %s225_s19  ;;  %p231_p7 = scmp.lt.s32.totalorder %s225_s19, %s225_s19 }
  0x10   :  { %p232_p8 = por %p231_p7, %p230_p6 }
  0x12   :  { %p233_p9 = pnand %p232_p8, %p226_p5 }
  0x14   :  { %236 = shalt.err (!%p233_p9)
}
  0x15   :  { %s265_s20 = smov 128   ;;  %s266_s21 = smov 8  }
  0x16   :  { %32 = dma.hbm_to_vmem [thread:$0]  %s305_s1, 384, %s27_s15, [#allocation6], %s265_s20, %s265_s20, %s266_s21  }
  0x17   :  { %257 = dma.done.wait [#allocation3], 32  }
  0x18   :  { %258 = vsyncadd [#allocation3], 4294967264 }
  0x19   :  { %259 = dma.done.wait [#allocation6], 384  }
  0x1a   :  { %260 = vsyncadd [#allocation6], 4294966912  ;;  %v267_v0 = vmov 0.0   ;;  %vm268_vm0 = vmmov 0   ;;  %vm64_vm1 = vcmask 162816   ;;  %vm47_vm2 = vcmask 156672  }
  0x1b   :  { %179 = vmatprep.subr.mxu0 %v267_v0  ;;  %185 = vmatprep.mubr.msk.f32.mxu0 %vm268_vm0, %v267_v0  ;;  %v44_v1 = vld [vmem:[#allocation5 + $0x10] sm:$0xf]  ;;  %v41_v2 = vld [vmem:[#allocation2] sm:$0x3]  ;;  %v43_v4 = vld [vmem:[#allocation5 + $0x8] sm:$0xff]  ;;  %s269_s25 = smov [#allocation7]  }
  0x1c   :  { %180 = vmatpush3.xpose.msk.msra.mxu0 %vm64_vm1, %v44_v1  ;;  %v46_v3 = vmul.f32 %v41_v2, %v41_v2  ;;  %v42_v6 = vld [vmem:[#allocation5] sm:$0xff]  ;;  %v170_v14 = vld [vmem:[%s306_s2] ss:$0 sm:$0xff]  ;;  %s160_s26 = sshll.u32 %s269_s25, 4  ;;  %v147_v16 = vmul.f32 0.5, %v41_v2  ;;  %s161_s26 = int_to_ptr.vmem [resolvable:$true] %s160_s26 }
  0x1d   :  { %181 = vmatprep.subr.mxu0 %v267_v0  ;;  %s237_s28 = scalar_lea.vmem %s161_s26, 32  ;;  %p242_p12 = scmp.lt.s32.totalorder %s161_s26, %s161_s26 }
  0x1e   :  { %v48_v5 = vsel %vm47_vm2, %v46_v3, 0.0  ;;  %p238_p11 = scmp.ne.s32.totalorder %s161_s26, %s237_s28  ;;  %p243_p13 = scmp.lt.s32.totalorder %s237_s28, %s237_s28 }
  0x1f   :  { %49 = vadd.xlane.f32.xlu0 %v48_v5 }
  0x20   :  { %182 = vmatpush3.xpose.msk.msra.mxu0 %vm64_vm1, %v43_v4  ;;  %p244_p0 = por %p243_p13, %p242_p12 }
  0x21   :  { %183 = vmatprep.subr.mxu0 %v267_v0 }
  0x22   :  { %p245_p1 = pnand %p244_p0, %p238_p11 }
  0x24   :  { %184 = vmatpush3.xpose.msk.msra.mxu0 %vm64_vm1, %v42_v6 }
  0x27   :  { %186 = vmatmul.mubr.msk.f32.vlgmr.msra.gmra.mxu0 %vm64_vm1, %v41_v2 }
  0xa8   :  { %v50_v7 = vpop.xlane.xlu0 %49 }
  0xa9   :  { %v51_v8 = vrot.slane %v50_v7, 4 }
  0xab   :  { %v52_v9 = vadd.f32 %v51_v8, %v50_v7 }
  0xad   :  { %v53_v10 = vrot.slane %v52_v9, 2 }
  0xaf   :  { %v54_v11 = vadd.f32 %v53_v10, %v52_v9 }
  0xb1   :  { %v55_v12 = vrot.slane %v54_v11, 1 }
  0xb3   :  { %v56_v13 = vadd.f32 %v55_v12, %v54_v11 }
  0xb5   :  { %188 = vpush %v56_v13 }
  0xe6   :  { %s189_s0 = spop %188 }
  0xe7   :  { %p148_p10 = scmp.gt.f32.partialorder %s189_s0, 1.0  ;;  %v143_v15 = vpop.f32.mrf.mxu0 }
  0xe8   :  { %v144_v17 = vadd.f32 %v170_v14, %v143_v15 }
  0xe9   :  { %s149_s27 = scalar_select %p148_p10, 1, 0  ;;  %v187_v18 = vpop.f32.mrf.mxu0 }
  0xeb   :  { %v150_v19 = vstv %s149_s27 }
  0xec   :  { %vm151_vm3 = vcmp.eq.s32.totalorder %v150_v19, 1 }
  0xed   :  { %v152_v20 = vsel %vm151_vm3, %v144_v17, %v147_v16 }
  0xee   :  { %153 = vst.msk [vmem:[#allocation7] sm:$0x3] %vm47_vm2, %v152_v20 }
  0xef   :  { %248 = shalt.err (!%p245_p1)
}
  0xf0   :  { %163 = dma.vmem_to_hbm [thread:$0]  %s161_s26, 32, %s307_s3, [#allocation4]  }
  0xf1   :  { %261 = dma.done.wait [#allocation4], 32  }
  0xf2   :  { %262 = vsyncadd [#allocation4], 4294967264 }
  0xf3   :  { %167 = vsyncpa [#allocation3], 1 }
  0xf4   :  { %168 = vsyncpa [#allocation6], 1 }
  0xf5   :  { %169 = vsyncpa [#allocation4], 1 }

</bundles_post_ra>
